<compile_context>
chip_gen: v5e
topology: v5e:2x2
jax: 0.10.0
libtpu: 0.0.40
codegen_flags: <defaults>
</compile_context>

<pallas_src>
import functools
import math

import jax
import jax.numpy as jnp
from jax.experimental import pallas as pl
from jax.experimental.pallas import tpu as pltpu


def _layernorm_f32(x, g, b, eps=1e-5):
    """LayerNorm over the last dim, all math in f32 (matches PyTorch LN)."""
    mu = jnp.mean(x, axis=-1, keepdims=True)
    xc = x - mu
    var = jnp.mean(xc * xc, axis=-1, keepdims=True)
    return xc * jax.lax.rsqrt(var + eps) * g + b


# --------------------------------------------------------------------------
# Fused per-layer kernel:
#   x = x + out_proj(MHA(ln_1(x)))
#   x = x + c_proj(QuickGELU(c_fc(ln_2(x))))
# One grid step processes a (Bt, L, D) tile of batch elements.
# --------------------------------------------------------------------------
def _layer_kernel(x_ref, mask_ref,
                  g1_ref, b1_ref, wqkv_ref, bqkv_ref, wo_ref, bo_ref,
                  g2_ref, b2_ref, wfc_ref, bfc_ref, wproj_ref, bproj_ref,
                  o_ref, attn_ref, *, n_head):
    xt = x_ref[...].astype(jnp.float32)                     # (Bt, L, D)
    Bt, L, D = xt.shape
    dh = D // n_head
    M = Bt * L
    x = xt.reshape(M, D)                                    # merge leading dims (free)

    # ---------------- attention half ----------------
    xn = _layernorm_f32(x, g1_ref[...], b1_ref[...])        # ln_1, f32

    # fused QKV projection: (M, D) @ (D, 3D), bf16 operands, f32 accumulation.
    # 1/sqrt(dh) is already folded into the Q block of wqkv/bqkv.
    qkv = jnp.dot(xn.astype(jnp.bfloat16), wqkv_ref[...],
                  preferred_element_type=jnp.float32) + bqkv_ref[...]   # (M, 3D) f32

    add_mask = mask_ref[...]                                # (Bt, 1, L), -1e30 on padded keys

    # Per-head attention (static unroll, n_head small).  Each head writes its
    # context into a disjoint lane slice of the f32 scratch slab, so there is
    # no carried accumulator and the out-projection below runs as ONE K=D
    # matmul at full MXU contraction fill.
    for h in range(n_head):
        lo = h * dh
        qh = qkv[:, lo:lo + dh].reshape(Bt, L, dh).astype(jnp.bfloat16)
        kh = qkv[:, D + lo:D + lo + dh].reshape(Bt, L, dh).astype(jnp.bfloat16)
        vh = qkv[:, 2 * D + lo:2 * D + lo + dh].reshape(Bt, L, dh).astype(jnp.bfloat16)

        s = jnp.einsum('bqd,bkd->bqk', qh, kh,
                       preferred_element_type=jnp.float32)  # (Bt, L, L) f32
        s = s + add_mask                                    # mask padded keys
        s = s - jnp.max(s, axis=-1, keepdims=True)
        p = jnp.exp(s)
        p = p * pl.reciprocal(jnp.sum(p, axis=-1, keepdims=True), approx=True)

        oh = jnp.einsum('bqk,bkd->bqd', p.astype(jnp.bfloat16), vh,
                        preferred_element_type=jnp.float32)  # (Bt, L, dh) f32
        attn_ref[:, lo:lo + dh] = oh.reshape(M, dh)

    # single full-K output projection: (M, D) @ (D, D)
    proj = jnp.dot(attn_ref[...].astype(jnp.bfloat16), wo_ref[...],
                   preferred_element_type=jnp.float32) + bo_ref[...]
    x = x + proj                                             # residual 1 (f32)

    # ---------------- MLP half ----------------
    xn2 = _layernorm_f32(x, g2_ref[...], b2_ref[...])        # ln_2, f32
    hmid = jnp.dot(xn2.astype(jnp.bfloat16), wfc_ref[...],
                   preferred_element_type=jnp.float32) + bfc_ref[...]   # (M, 4D) f32
    hmid = hmid * jax.nn.sigmoid(1.702 * hmid)               # QuickGELU (f32)
    mlp = jnp.dot(hmid.astype(jnp.bfloat16), wproj_ref[...],
                  preferred_element_type=jnp.float32) + bproj_ref[...]  # (M, D) f32

    o_ref[...] = (x + mlp).reshape(Bt, L, D)


# --------------------------------------------------------------------------
# pallas_call wrapper for one layer
# --------------------------------------------------------------------------
def _vmem_limit_bytes():
    """Scoped-VMEM budget derived from the chip: ~96 MiB on v5e/v6e (128 MiB
    physical), ~48 MiB on v7x (64 MiB physical)."""
    mib = 1024 * 1024
    try:
        phys = int(pltpu.get_tpu_info().vmem_capacity_bytes)
    except Exception:
        phys = 64 * mib
    return int(min(96 * mib, max(32 * mib, phys - 16 * mib)))


def _layer(x, add_mask, p, n_head, bt):
    B, L, D = x.shape
    H = 4 * D
    tile = lambda b: (b, 0, 0)
    rep2 = lambda b: (0, 0)
    # Constant-index operands never change block -> single-buffer them so the
    # resident weights only occupy one copy of VMEM.
    wspec = lambda shape: pl.BlockSpec(shape, rep2, pipeline_mode=pl.Buffered(1))
    kernel = functools.partial(_layer_kernel, n_head=n_head)
    return pl.pallas_call(
        kernel,
        out_shape=jax.ShapeDtypeStruct((B, L, D), jnp.float32),
        grid=(B // bt,),
        in_specs=[
            pl.BlockSpec((bt, L, D), tile),        # x tile (double-buffered)
            pl.BlockSpec((bt, 1, L), tile),        # additive key mask
            wspec((1, D)),                         # ln_1 gamma
            wspec((1, D)),                         # ln_1 beta
            wspec((D, 3 * D)),                     # in_proj weight (bf16, Q pre-scaled)
            wspec((1, 3 * D)),                     # in_proj bias   (f32)
            wspec((D, D)),                         # out_proj weight (bf16)
            wspec((1, D)),                         # out_proj bias   (f32)
            wspec((1, D)),                         # ln_2 gamma
            wspec((1, D)),                         # ln_2 beta
            wspec((D, H)),                         # c_fc weight (bf16)
            wspec((1, H)),                         # c_fc bias   (f32)
            wspec((H, D)),                         # c_proj weight (bf16)
            wspec((1, D)),                         # c_proj bias   (f32)
        ],
        out_specs=pl.BlockSpec((bt, L, D), tile),
        scratch_shapes=[pltpu.VMEM((bt * L, D), jnp.float32)],   # per-head attn outputs
        compiler_params=pltpu.CompilerParams(
            dimension_semantics=("parallel",),
            vmem_limit_bytes=_vmem_limit_bytes()),
    )(x, add_mask, p["ln1_g"], p["ln1_b"], p["wqkv"], p["bqkv"],
      p["wo"], p["bo"], p["ln2_g"], p["ln2_b"],
      p["w_fc"], p["b_fc"], p["w_proj"], p["b_proj"])


def _pick_batch_tile(B, L, target_rows=512):
    """Largest Bt dividing B with Bt*L roughly <= target_rows, but always
    leaving >= 2 grid steps when B >= 2 (v7x dual-TC sharding / pipelining)."""
    bt = max(1, min(B, target_rows // max(L, 1)))
    if B >= 2:
        bt = min(bt, B // 2)
    bt = max(bt, 1)
    while B % bt:
        bt -= 1
    return bt


@functools.partial(jax.jit, static_argnames=("n_head",))
def transformer_forward(x_lbd, padding_mask, params, n_head):
    """x_lbd: (L, B, D) float32 ; padding_mask: (B, L) bool (True = pad).
    Returns (x, padding_mask) like the PyTorch module."""
    L, B, D = x_lbd.shape
    x = jnp.transpose(x_lbd, (1, 0, 2)).astype(jnp.float32)          # (B, L, D)

    # Pad the sequence to a multiple of 16 (bf16 sublane packing); padded keys
    # are masked below and padded query rows are sliced off at the end.
    Lp = -(-L // 16) * 16
    if Lp != L:
        x = jnp.pad(x, ((0, 0), (0, Lp - L), (0, 0)))
        pm = jnp.pad(padding_mask, ((0, 0), (0, Lp - L)), constant_values=True)
    else:
        pm = padding_mask
    add_mask = jnp.where(pm, -1e30, 0.0).astype(jnp.float32)[:, None, :]  # (B, 1, Lp)

    bt = _pick_batch_tile(B, Lp)
    for p in params:
        x = _layer(x, add_mask, p, n_head, bt)
    x = x[:, :L, :]
    return jnp.transpose(x, (1, 0, 2)), padding_mask


# --------------------------------------------------------------------------
# Deterministic synthetic parameter init (matmul weights stored in bf16).
# The 1/sqrt(dh) attention scale is folded into the Q block of wqkv/bqkv.
# --------------------------------------------------------------------------
def init_params(key, width, layers, heads):
    D = width
    dh = D // heads
    scale = 1.0 / math.sqrt(dh)
    params = []
    for l in range(layers):
        ks = jax.random.split(jax.random.fold_in(key, l), 4)
        s = 0.02
        wqkv = s * jax.random.normal(ks[0], (D, 3 * D), jnp.float32)
        wqkv = wqkv.at[:, :D].multiply(scale)                 # fold q-scale (f32, then cast)
        bqkv = jnp.zeros((1, 3 * D), jnp.float32)
        bqkv = bqkv.at[:, :D].multiply(scale)
        params.append(dict(
            ln1_g=jnp.ones((1, D), jnp.float32),
            ln1_b=jnp.zeros((1, D), jnp.float32),
            wqkv=wqkv.astype(jnp.bfloat16),
            bqkv=bqkv,
            wo=(s * jax.random.normal(ks[1], (D, D), jnp.float32)).astype(jnp.bfloat16),
            bo=jnp.zeros((1, D), jnp.float32),
            ln2_g=jnp.ones((1, D), jnp.float32),
            ln2_b=jnp.zeros((1, D), jnp.float32),
            w_fc=(s * jax.random.normal(ks[2], (D, 4 * D), jnp.float32)).astype(jnp.bfloat16),
            b_fc=jnp.zeros((1, 4 * D), jnp.float32),
            w_proj=(s * jax.random.normal(ks[3], (4 * D, D), jnp.float32)).astype(jnp.bfloat16),
            b_proj=jnp.zeros((1, D), jnp.float32),
        ))
    return params


if __name__ == "__main__":
    # small shapes: width=32, layers=2, heads=4, seq=8, batch=2
    L, B, D, HEADS, LAYERS = 8, 2, 32, 4, 2
    key = jax.random.PRNGKey(0)
    kx, kp = jax.random.split(key)

    x = jax.random.normal(kx, (L, B, D), jnp.float32)           # (seq, batch, width)
    # batch 0: no padding; batch 1: last two positions padded
    padding_mask = jnp.zeros((B, L), dtype=bool).at[1, -2:].set(True)

    params = init_params(kp, D, LAYERS, HEADS)

    out, out_mask = transformer_forward(x, padding_mask, params, n_head=HEADS)
    out = jax.block_until_ready(out)

    assert out.shape == (L, B, D) and out.dtype == jnp.float32
    assert bool(jnp.all(jnp.isfinite(out)))
    print("KERNEL_OK")
</pallas_src>

<mosaic_0001>
module attributes {stable_mosaic.version = 11 : i64} {
  func.func @_layer_kernel(%arg0: i32, %arg1: memref<1x16x32xf32, #tpu.memory_space<vmem>>, %arg2: memref<1x1x16xf32, #tpu.memory_space<vmem>>, %arg3: memref<1x32xf32, #tpu.memory_space<vmem>>, %arg4: memref<1x32xf32, #tpu.memory_space<vmem>>, %arg5: memref<32x96xbf16, #tpu.memory_space<vmem>>, %arg6: memref<1x96xf32, #tpu.memory_space<vmem>>, %arg7: memref<32x32xbf16, #tpu.memory_space<vmem>>, %arg8: memref<1x32xf32, #tpu.memory_space<vmem>>, %arg9: memref<1x32xf32, #tpu.memory_space<vmem>>, %arg10: memref<1x32xf32, #tpu.memory_space<vmem>>, %arg11: memref<32x128xbf16, #tpu.memory_space<vmem>>, %arg12: memref<1x128xf32, #tpu.memory_space<vmem>>, %arg13: memref<128x32xbf16, #tpu.memory_space<vmem>>, %arg14: memref<1x32xf32, #tpu.memory_space<vmem>>, %arg15: memref<1x16x32xf32, #tpu.memory_space<vmem>>, %arg16: memref<16x32xf32, #tpu.memory_space<vmem>>) attributes {dimension_semantics = [#tpu.dimension_semantics<parallel>], iteration_bounds = array<i64: 2>, scalar_prefetch = 0 : i64, scratch_operands = 1 : i64, tpu.core_type = #tpu.core_type<tc>, window_params = [{transform_indices = @transform_0, window_bounds = array<i64: 1, 16, 32>}, {transform_indices = @transform_1, window_bounds = array<i64: 1, 1, 16>}, {pipeline_mode = #tpu.pipeline_mode<synchronous>, transform_indices = @transform_2, window_bounds = array<i64: 1, 32>}, {pipeline_mode = #tpu.pipeline_mode<synchronous>, transform_indices = @transform_3, window_bounds = array<i64: 1, 32>}, {pipeline_mode = #tpu.pipeline_mode<synchronous>, transform_indices = @transform_4, window_bounds = array<i64: 32, 96>}, {pipeline_mode = #tpu.pipeline_mode<synchronous>, transform_indices = @transform_5, window_bounds = array<i64: 1, 96>}, {pipeline_mode = #tpu.pipeline_mode<synchronous>, transform_indices = @transform_6, window_bounds = array<i64: 32, 32>}, {pipeline_mode = #tpu.pipeline_mode<synchronous>, transform_indices = @transform_7, window_bounds = array<i64: 1, 32>}, {pipeline_mode = #tpu.pipeline_mode<synchronous>, transform_indices = @transform_8, window_bounds = array<i64: 1, 32>}, {pipeline_mode = #tpu.pipeline_mode<synchronous>, transform_indices = @transform_9, window_bounds = array<i64: 1, 32>}, {pipeline_mode = #tpu.pipeline_mode<synchronous>, transform_indices = @transform_10, window_bounds = array<i64: 32, 128>}, {pipeline_mode = #tpu.pipeline_mode<synchronous>, transform_indices = @transform_11, window_bounds = array<i64: 1, 128>}, {pipeline_mode = #tpu.pipeline_mode<synchronous>, transform_indices = @transform_12, window_bounds = array<i64: 128, 32>}, {pipeline_mode = #tpu.pipeline_mode<synchronous>, transform_indices = @transform_13, window_bounds = array<i64: 1, 32>}, {transform_indices = @transform_14, window_bounds = array<i64: 1, 16, 32>}]} {
    %c0 = arith.constant 0 : index
    %c0_0 = arith.constant 0 : index
    %c0_1 = arith.constant 0 : index
    %0 = vector.load %arg1[%c0, %c0_0, %c0_1] : memref<1x16x32xf32, #tpu.memory_space<vmem>>, vector<1x16x32xf32>
    %1 = vector.shape_cast %0 : vector<1x16x32xf32> to vector<16x32xf32>
    %c0_2 = arith.constant 0 : index
    %c0_3 = arith.constant 0 : index
    %2 = vector.load %arg3[%c0_2, %c0_3] : memref<1x32xf32, #tpu.memory_space<vmem>>, vector<1x32xf32>
    %c0_4 = arith.constant 0 : index
    %c0_5 = arith.constant 0 : index
    %3 = vector.load %arg4[%c0_4, %c0_5] : memref<1x32xf32, #tpu.memory_space<vmem>>, vector<1x32xf32>
    %cst = arith.constant dense<0.000000e+00> : vector<16xf32>
    %4 = vector.multi_reduction <add>, %1, %cst [1] : vector<16x32xf32> to vector<16xf32>
    %5 = vector.shape_cast %4 : vector<16xf32> to vector<16x1xf32>
    %cst_6 = arith.constant 3.200000e+01 : f32
    %6 = vector.broadcast %cst_6 : f32 to vector<16x1xf32>
    %7 = arith.divf %5, %6 : vector<16x1xf32>
    %8 = vector.broadcast %7 : vector<16x1xf32> to vector<16x32xf32>
    %9 = arith.subf %1, %8 : vector<16x32xf32>
    %10 = arith.mulf %9, %9 : vector<16x32xf32>
    %cst_7 = arith.constant dense<0.000000e+00> : vector<16xf32>
    %11 = vector.multi_reduction <add>, %10, %cst_7 [1] : vector<16x32xf32> to vector<16xf32>
    %12 = vector.shape_cast %11 : vector<16xf32> to vector<16x1xf32>
    %cst_8 = arith.constant 3.200000e+01 : f32
    %13 = vector.broadcast %cst_8 : f32 to vector<16x1xf32>
    %14 = arith.divf %12, %13 : vector<16x1xf32>
    %cst_9 = arith.constant 9.99999974E-6 : f32
    %15 = vector.broadcast %cst_9 : f32 to vector<16x1xf32>
    %16 = arith.addf %14, %15 : vector<16x1xf32>
    %17 = math.rsqrt %16 : vector<16x1xf32>
    %18 = vector.broadcast %17 : vector<16x1xf32> to vector<16x32xf32>
    %19 = arith.mulf %9, %18 : vector<16x32xf32>
    %20 = vector.broadcast %2 : vector<1x32xf32> to vector<16x32xf32>
    %21 = arith.mulf %19, %20 : vector<16x32xf32>
    %22 = vector.broadcast %3 : vector<1x32xf32> to vector<16x32xf32>
    %23 = arith.addf %21, %22 : vector<16x32xf32>
    %24 = arith.truncf %23 : vector<16x32xf32> to vector<16x32xbf16>
    %c0_10 = arith.constant 0 : index
    %c0_11 = arith.constant 0 : index
    %25 = vector.load %arg5[%c0_10, %c0_11] : memref<32x96xbf16, #tpu.memory_space<vmem>>, vector<32x96xbf16>
    %cst_12 = arith.constant dense<0.000000e+00> : vector<16x96xf32>
    %26 = tpu.matmul %24, %25, %cst_12 {dimension_numbers = #tpu.dot_dimension_numbers<[1], [0], [0], [1], [0, 0, 1, 1], [], []>} : vector<16x32xbf16>, vector<32x96xbf16>, vector<16x96xf32> -> vector<16x96xf32>
    %c0_13 = arith.constant 0 : index
    %c0_14 = arith.constant 0 : index
    %27 = vector.load %arg6[%c0_13, %c0_14] : memref<1x96xf32, #tpu.memory_space<vmem>>, vector<1x96xf32>
    %28 = vector.broadcast %27 : vector<1x96xf32> to vector<16x96xf32>
    %29 = arith.addf %26, %28 : vector<16x96xf32>
    %c0_15 = arith.constant 0 : index
    %c0_16 = arith.constant 0 : index
    %c0_17 = arith.constant 0 : index
    %30 = vector.load %arg2[%c0_15, %c0_16, %c0_17] : memref<1x1x16xf32, #tpu.memory_space<vmem>>, vector<1x1x16xf32>
    %31 = vector.extract_strided_slice %29 {offsets = [0, 0], sizes = [16, 8], strides = [1, 1]} : vector<16x96xf32> to vector<16x8xf32>
    %32 = vector.shape_cast %31 : vector<16x8xf32> to vector<1x16x8xf32>
    %33 = arith.truncf %32 : vector<1x16x8xf32> to vector<1x16x8xbf16>
    %34 = vector.extract_strided_slice %29 {offsets = [0, 32], sizes = [16, 8], strides = [1, 1]} : vector<16x96xf32> to vector<16x8xf32>
    %35 = vector.shape_cast %34 : vector<16x8xf32> to vector<1x16x8xf32>
    %36 = arith.truncf %35 : vector<1x16x8xf32> to vector<1x16x8xbf16>
    %37 = vector.extract_strided_slice %29 {offsets = [0, 64], sizes = [16, 8], strides = [1, 1]} : vector<16x96xf32> to vector<16x8xf32>
    %38 = vector.shape_cast %37 : vector<16x8xf32> to vector<1x16x8xf32>
    %39 = arith.truncf %38 : vector<1x16x8xf32> to vector<1x16x8xbf16>
    "tpu.trace_start"() <{level = 10 : i32, message = "bqd,bkd->bqk"}> : () -> ()
    %cst_18 = arith.constant dense<0.000000e+00> : vector<1x16x16xf32>
    %40 = tpu.matmul %33, %36, %cst_18 {dimension_numbers = #tpu.dot_dimension_numbers<[2], [2], [1], [1], [0, 0, 0, 1, 1, 1], [0], [0]>} : vector<1x16x8xbf16>, vector<1x16x8xbf16>, vector<1x16x16xf32> -> vector<1x16x16xf32>
    "tpu.trace_stop"() : () -> ()
    %41 = vector.broadcast %30 : vector<1x1x16xf32> to vector<1x16x16xf32>
    %42 = arith.addf %40, %41 : vector<1x16x16xf32>
    %cst_19 = arith.constant dense<0xFF800000> : vector<1x16xf32>
    %43 = vector.multi_reduction <maximumf>, %42, %cst_19 [2] : vector<1x16x16xf32> to vector<1x16xf32>
    %44 = vector.shape_cast %43 : vector<1x16xf32> to vector<1x16x1xf32>
    %45 = vector.broadcast %44 : vector<1x16x1xf32> to vector<1x16x16xf32>
    %46 = arith.subf %42, %45 : vector<1x16x16xf32>
    %47 = math.exp %46 : vector<1x16x16xf32>
    %cst_20 = arith.constant dense<0.000000e+00> : vector<1x16xf32>
    %48 = vector.multi_reduction <add>, %47, %cst_20 [2] : vector<1x16x16xf32> to vector<1x16xf32>
    %49 = vector.shape_cast %48 : vector<1x16xf32> to vector<1x16x1xf32>
    %50 = tpu.reciprocal %49 {approx = true} : vector<1x16x1xf32> -> vector<1x16x1xf32>
    %51 = vector.broadcast %50 : vector<1x16x1xf32> to vector<1x16x16xf32>
    %52 = arith.mulf %47, %51 : vector<1x16x16xf32>
    %53 = arith.truncf %52 : vector<1x16x16xf32> to vector<1x16x16xbf16>
    "tpu.trace_start"() <{level = 10 : i32, message = "bqk,bkd->bqd"}> : () -> ()
    %cst_21 = arith.constant dense<0.000000e+00> : vector<1x16x8xf32>
    %54 = tpu.matmul %53, %39, %cst_21 {dimension_numbers = #tpu.dot_dimension_numbers<[2], [1], [1], [2], [0, 0, 0, 1, 1, 2], [0], [0]>} : vector<1x16x16xbf16>, vector<1x16x8xbf16>, vector<1x16x8xf32> -> vector<1x16x8xf32>
    "tpu.trace_stop"() : () -> ()
    %55 = vector.shape_cast %54 : vector<1x16x8xf32> to vector<16x8xf32>
    %c0_22 = arith.constant 0 : index
    %c0_23 = arith.constant 0 : index
    %56 = vector.load %arg16[%c0_22, %c0_23] : memref<16x32xf32, #tpu.memory_space<vmem>>, vector<16x8xf32>
    tpu.vector_store %arg16[%c0_22, %c0_23], %55 {strides = array<i32>} : memref<16x32xf32, #tpu.memory_space<vmem>>, vector<16x8xf32>,
    %57 = vector.extract_strided_slice %29 {offsets = [0, 8], sizes = [16, 8], strides = [1, 1]} : vector<16x96xf32> to vector<16x8xf32>
    %58 = vector.shape_cast %57 : vector<16x8xf32> to vector<1x16x8xf32>
    %59 = arith.truncf %58 : vector<1x16x8xf32> to vector<1x16x8xbf16>
    %60 = vector.extract_strided_slice %29 {offsets = [0, 40], sizes = [16, 8], strides = [1, 1]} : vector<16x96xf32> to vector<16x8xf32>
    %61 = vector.shape_cast %60 : vector<16x8xf32> to vector<1x16x8xf32>
    %62 = arith.truncf %61 : vector<1x16x8xf32> to vector<1x16x8xbf16>
    %63 = vector.extract_strided_slice %29 {offsets = [0, 72], sizes = [16, 8], strides = [1, 1]} : vector<16x96xf32> to vector<16x8xf32>
    %64 = vector.shape_cast %63 : vector<16x8xf32> to vector<1x16x8xf32>
    %65 = arith.truncf %64 : vector<1x16x8xf32> to vector<1x16x8xbf16>
    "tpu.trace_start"() <{level = 10 : i32, message = "bqd,bkd->bqk"}> : () -> ()
    %cst_24 = arith.constant dense<0.000000e+00> : vector<1x16x16xf32>
    %66 = tpu.matmul %59, %62, %cst_24 {dimension_numbers = #tpu.dot_dimension_numbers<[2], [2], [1], [1], [0, 0, 0, 1, 1, 1], [0], [0]>} : vector<1x16x8xbf16>, vector<1x16x8xbf16>, vector<1x16x16xf32> -> vector<1x16x16xf32>
    "tpu.trace_stop"() : () -> ()
    %67 = vector.broadcast %30 : vector<1x1x16xf32> to vector<1x16x16xf32>
    %68 = arith.addf %66, %67 : vector<1x16x16xf32>
    %cst_25 = arith.constant dense<0xFF800000> : vector<1x16xf32>
    %69 = vector.multi_reduction <maximumf>, %68, %cst_25 [2] : vector<1x16x16xf32> to vector<1x16xf32>
    %70 = vector.shape_cast %69 : vector<1x16xf32> to vector<1x16x1xf32>
    %71 = vector.broadcast %70 : vector<1x16x1xf32> to vector<1x16x16xf32>
    %72 = arith.subf %68, %71 : vector<1x16x16xf32>
    %73 = math.exp %72 : vector<1x16x16xf32>
    %cst_26 = arith.constant dense<0.000000e+00> : vector<1x16xf32>
    %74 = vector.multi_reduction <add>, %73, %cst_26 [2] : vector<1x16x16xf32> to vector<1x16xf32>
    %75 = vector.shape_cast %74 : vector<1x16xf32> to vector<1x16x1xf32>
    %76 = tpu.reciprocal %75 {approx = true} : vector<1x16x1xf32> -> vector<1x16x1xf32>
    %77 = vector.broadcast %76 : vector<1x16x1xf32> to vector<1x16x16xf32>
    %78 = arith.mulf %73, %77 : vector<1x16x16xf32>
    %79 = arith.truncf %78 : vector<1x16x16xf32> to vector<1x16x16xbf16>
    "tpu.trace_start"() <{level = 10 : i32, message = "bqk,bkd->bqd"}> : () -> ()
    %cst_27 = arith.constant dense<0.000000e+00> : vector<1x16x8xf32>
    %80 = tpu.matmul %79, %65, %cst_27 {dimension_numbers = #tpu.dot_dimension_numbers<[2], [1], [1], [2], [0, 0, 0, 1, 1, 2], [0], [0]>} : vector<1x16x16xbf16>, vector<1x16x8xbf16>, vector<1x16x8xf32> -> vector<1x16x8xf32>
    "tpu.trace_stop"() : () -> ()
    %81 = vector.shape_cast %80 : vector<1x16x8xf32> to vector<16x8xf32>
    %c0_28 = arith.constant 0 : index
    %c8 = arith.constant 8 : index
    %82 = vector.load %arg16[%c0_28, %c8] : memref<16x32xf32, #tpu.memory_space<vmem>>, vector<16x8xf32>
    tpu.vector_store %arg16[%c0_28, %c8], %81 {strides = array<i32>} : memref<16x32xf32, #tpu.memory_space<vmem>>, vector<16x8xf32>,
    %83 = vector.extract_strided_slice %29 {offsets = [0, 16], sizes = [16, 8], strides = [1, 1]} : vector<16x96xf32> to vector<16x8xf32>
    %84 = vector.shape_cast %83 : vector<16x8xf32> to vector<1x16x8xf32>
    %85 = arith.truncf %84 : vector<1x16x8xf32> to vector<1x16x8xbf16>
    %86 = vector.extract_strided_slice %29 {offsets = [0, 48], sizes = [16, 8], strides = [1, 1]} : vector<16x96xf32> to vector<16x8xf32>
    %87 = vector.shape_cast %86 : vector<16x8xf32> to vector<1x16x8xf32>
    %88 = arith.truncf %87 : vector<1x16x8xf32> to vector<1x16x8xbf16>
    %89 = vector.extract_strided_slice %29 {offsets = [0, 80], sizes = [16, 8], strides = [1, 1]} : vector<16x96xf32> to vector<16x8xf32>
    %90 = vector.shape_cast %89 : vector<16x8xf32> to vector<1x16x8xf32>
    %91 = arith.truncf %90 : vector<1x16x8xf32> to vector<1x16x8xbf16>
    "tpu.trace_start"() <{level = 10 : i32, message = "bqd,bkd->bqk"}> : () -> ()
    %cst_29 = arith.constant dense<0.000000e+00> : vector<1x16x16xf32>
    %92 = tpu.matmul %85, %88, %cst_29 {dimension_numbers = #tpu.dot_dimension_numbers<[2], [2], [1], [1], [0, 0, 0, 1, 1, 1], [0], [0]>} : vector<1x16x8xbf16>, vector<1x16x8xbf16>, vector<1x16x16xf32> -> vector<1x16x16xf32>
    "tpu.trace_stop"() : () -> ()
    %93 = vector.broadcast %30 : vector<1x1x16xf32> to vector<1x16x16xf32>
    %94 = arith.addf %92, %93 : vector<1x16x16xf32>
    %cst_30 = arith.constant dense<0xFF800000> : vector<1x16xf32>
    %95 = vector.multi_reduction <maximumf>, %94, %cst_30 [2] : vector<1x16x16xf32> to vector<1x16xf32>
    %96 = vector.shape_cast %95 : vector<1x16xf32> to vector<1x16x1xf32>
    %97 = vector.broadcast %96 : vector<1x16x1xf32> to vector<1x16x16xf32>
    %98 = arith.subf %94, %97 : vector<1x16x16xf32>
    %99 = math.exp %98 : vector<1x16x16xf32>
    %cst_31 = arith.constant dense<0.000000e+00> : vector<1x16xf32>
    %100 = vector.multi_reduction <add>, %99, %cst_31 [2] : vector<1x16x16xf32> to vector<1x16xf32>
    %101 = vector.shape_cast %100 : vector<1x16xf32> to vector<1x16x1xf32>
    %102 = tpu.reciprocal %101 {approx = true} : vector<1x16x1xf32> -> vector<1x16x1xf32>
    %103 = vector.broadcast %102 : vector<1x16x1xf32> to vector<1x16x16xf32>
    %104 = arith.mulf %99, %103 : vector<1x16x16xf32>
    %105 = arith.truncf %104 : vector<1x16x16xf32> to vector<1x16x16xbf16>
    "tpu.trace_start"() <{level = 10 : i32, message = "bqk,bkd->bqd"}> : () -> ()
    %cst_32 = arith.constant dense<0.000000e+00> : vector<1x16x8xf32>
    %106 = tpu.matmul %105, %91, %cst_32 {dimension_numbers = #tpu.dot_dimension_numbers<[2], [1], [1], [2], [0, 0, 0, 1, 1, 2], [0], [0]>} : vector<1x16x16xbf16>, vector<1x16x8xbf16>, vector<1x16x8xf32> -> vector<1x16x8xf32>
    "tpu.trace_stop"() : () -> ()
    %107 = vector.shape_cast %106 : vector<1x16x8xf32> to vector<16x8xf32>
    %c0_33 = arith.constant 0 : index
    %c16 = arith.constant 16 : index
    %108 = vector.load %arg16[%c0_33, %c16] : memref<16x32xf32, #tpu.memory_space<vmem>>, vector<16x8xf32>
    tpu.vector_store %arg16[%c0_33, %c16], %107 {strides = array<i32>} : memref<16x32xf32, #tpu.memory_space<vmem>>, vector<16x8xf32>,
    %109 = vector.extract_strided_slice %29 {offsets = [0, 24], sizes = [16, 8], strides = [1, 1]} : vector<16x96xf32> to vector<16x8xf32>
    %110 = vector.shape_cast %109 : vector<16x8xf32> to vector<1x16x8xf32>
    %111 = arith.truncf %110 : vector<1x16x8xf32> to vector<1x16x8xbf16>
    %112 = vector.extract_strided_slice %29 {offsets = [0, 56], sizes = [16, 8], strides = [1, 1]} : vector<16x96xf32> to vector<16x8xf32>
    %113 = vector.shape_cast %112 : vector<16x8xf32> to vector<1x16x8xf32>
    %114 = arith.truncf %113 : vector<1x16x8xf32> to vector<1x16x8xbf16>
    %115 = vector.extract_strided_slice %29 {offsets = [0, 88], sizes = [16, 8], strides = [1, 1]} : vector<16x96xf32> to vector<16x8xf32>
    %116 = vector.shape_cast %115 : vector<16x8xf32> to vector<1x16x8xf32>
    %117 = arith.truncf %116 : vector<1x16x8xf32> to vector<1x16x8xbf16>
    "tpu.trace_start"() <{level = 10 : i32, message = "bqd,bkd->bqk"}> : () -> ()
    %cst_34 = arith.constant dense<0.000000e+00> : vector<1x16x16xf32>
    %118 = tpu.matmul %111, %114, %cst_34 {dimension_numbers = #tpu.dot_dimension_numbers<[2], [2], [1], [1], [0, 0, 0, 1, 1, 1], [0], [0]>} : vector<1x16x8xbf16>, vector<1x16x8xbf16>, vector<1x16x16xf32> -> vector<1x16x16xf32>
    "tpu.trace_stop"() : () -> ()
    %119 = vector.broadcast %30 : vector<1x1x16xf32> to vector<1x16x16xf32>
    %120 = arith.addf %118, %119 : vector<1x16x16xf32>
    %cst_35 = arith.constant dense<0xFF800000> : vector<1x16xf32>
    %121 = vector.multi_reduction <maximumf>, %120, %cst_35 [2] : vector<1x16x16xf32> to vector<1x16xf32>
    %122 = vector.shape_cast %121 : vector<1x16xf32> to vector<1x16x1xf32>
    %123 = vector.broadcast %122 : vector<1x16x1xf32> to vector<1x16x16xf32>
    %124 = arith.subf %120, %123 : vector<1x16x16xf32>
    %125 = math.exp %124 : vector<1x16x16xf32>
    %cst_36 = arith.constant dense<0.000000e+00> : vector<1x16xf32>
    %126 = vector.multi_reduction <add>, %125, %cst_36 [2] : vector<1x16x16xf32> to vector<1x16xf32>
    %127 = vector.shape_cast %126 : vector<1x16xf32> to vector<1x16x1xf32>
    %128 = tpu.reciprocal %127 {approx = true} : vector<1x16x1xf32> -> vector<1x16x1xf32>
    %129 = vector.broadcast %128 : vector<1x16x1xf32> to vector<1x16x16xf32>
    %130 = arith.mulf %125, %129 : vector<1x16x16xf32>
    %131 = arith.truncf %130 : vector<1x16x16xf32> to vector<1x16x16xbf16>
    "tpu.trace_start"() <{level = 10 : i32, message = "bqk,bkd->bqd"}> : () -> ()
    %cst_37 = arith.constant dense<0.000000e+00> : vector<1x16x8xf32>
    %132 = tpu.matmul %131, %117, %cst_37 {dimension_numbers = #tpu.dot_dimension_numbers<[2], [1], [1], [2], [0, 0, 0, 1, 1, 2], [0], [0]>} : vector<1x16x16xbf16>, vector<1x16x8xbf16>, vector<1x16x8xf32> -> vector<1x16x8xf32>
    "tpu.trace_stop"() : () -> ()
    %133 = vector.shape_cast %132 : vector<1x16x8xf32> to vector<16x8xf32>
    %c0_38 = arith.constant 0 : index
    %c24 = arith.constant 24 : index
    %134 = vector.load %arg16[%c0_38, %c24] : memref<16x32xf32, #tpu.memory_space<vmem>>, vector<16x8xf32>
    tpu.vector_store %arg16[%c0_38, %c24], %133 {strides = array<i32>} : memref<16x32xf32, #tpu.memory_space<vmem>>, vector<16x8xf32>,
    %c0_39 = arith.constant 0 : index
    %c0_40 = arith.constant 0 : index
    %135 = vector.load %arg16[%c0_39, %c0_40] : memref<16x32xf32, #tpu.memory_space<vmem>>, vector<16x32xf32>
    %136 = arith.truncf %135 : vector<16x32xf32> to vector<16x32xbf16>
    %c0_41 = arith.constant 0 : index
    %c0_42 = arith.constant 0 : index
    %137 = vector.load %arg7[%c0_41, %c0_42] : memref<32x32xbf16, #tpu.memory_space<vmem>>, vector<32x32xbf16>
    %cst_43 = arith.constant dense<0.000000e+00> : vector<16x32xf32>
    %138 = tpu.matmul %136, %137, %cst_43 {dimension_numbers = #tpu.dot_dimension_numbers<[1], [0], [0], [1], [0, 0, 1, 1], [], []>} : vector<16x32xbf16>, vector<32x32xbf16>, vector<16x32xf32> -> vector<16x32xf32>
    %c0_44 = arith.constant 0 : index
    %c0_45 = arith.constant 0 : index
    %139 = vector.load %arg8[%c0_44, %c0_45] : memref<1x32xf32, #tpu.memory_space<vmem>>, vector<1x32xf32>
    %140 = vector.broadcast %139 : vector<1x32xf32> to vector<16x32xf32>
    %141 = arith.addf %138, %140 : vector<16x32xf32>
    %142 = arith.addf %1, %141 : vector<16x32xf32>
    %c0_46 = arith.constant 0 : index
    %c0_47 = arith.constant 0 : index
    %143 = vector.load %arg9[%c0_46, %c0_47] : memref<1x32xf32, #tpu.memory_space<vmem>>, vector<1x32xf32>
    %c0_48 = arith.constant 0 : index
    %c0_49 = arith.constant 0 : index
    %144 = vector.load %arg10[%c0_48, %c0_49] : memref<1x32xf32, #tpu.memory_space<vmem>>, vector<1x32xf32>
    %cst_50 = arith.constant dense<0.000000e+00> : vector<16xf32>
    %145 = vector.multi_reduction <add>, %142, %cst_50 [1] : vector<16x32xf32> to vector<16xf32>
    %146 = vector.shape_cast %145 : vector<16xf32> to vector<16x1xf32>
    %cst_51 = arith.constant 3.200000e+01 : f32
    %147 = vector.broadcast %cst_51 : f32 to vector<16x1xf32>
    %148 = arith.divf %146, %147 : vector<16x1xf32>
    %149 = vector.broadcast %148 : vector<16x1xf32> to vector<16x32xf32>
    %150 = arith.subf %142, %149 : vector<16x32xf32>
    %151 = arith.mulf %150, %150 : vector<16x32xf32>
    %cst_52 = arith.constant dense<0.000000e+00> : vector<16xf32>
    %152 = vector.multi_reduction <add>, %151, %cst_52 [1] : vector<16x32xf32> to vector<16xf32>
    %153 = vector.shape_cast %152 : vector<16xf32> to vector<16x1xf32>
    %cst_53 = arith.constant 3.200000e+01 : f32
    %154 = vector.broadcast %cst_53 : f32 to vector<16x1xf32>
    %155 = arith.divf %153, %154 : vector<16x1xf32>
    %cst_54 = arith.constant 9.99999974E-6 : f32
    %156 = vector.broadcast %cst_54 : f32 to vector<16x1xf32>
    %157 = arith.addf %155, %156 : vector<16x1xf32>
    %158 = math.rsqrt %157 : vector<16x1xf32>
    %159 = vector.broadcast %158 : vector<16x1xf32> to vector<16x32xf32>
    %160 = arith.mulf %150, %159 : vector<16x32xf32>
    %161 = vector.broadcast %143 : vector<1x32xf32> to vector<16x32xf32>
    %162 = arith.mulf %160, %161 : vector<16x32xf32>
    %163 = vector.broadcast %144 : vector<1x32xf32> to vector<16x32xf32>
    %164 = arith.addf %162, %163 : vector<16x32xf32>
    %165 = arith.truncf %164 : vector<16x32xf32> to vector<16x32xbf16>
    %c0_55 = arith.constant 0 : index
    %c0_56 = arith.constant 0 : index
    %166 = vector.load %arg11[%c0_55, %c0_56] : memref<32x128xbf16, #tpu.memory_space<vmem>>, vector<32x128xbf16>
    %cst_57 = arith.constant dense<0.000000e+00> : vector<16x128xf32>
    %167 = tpu.matmul %165, %166, %cst_57 {dimension_numbers = #tpu.dot_dimension_numbers<[1], [0], [0], [1], [0, 0, 1, 1], [], []>} : vector<16x32xbf16>, vector<32x128xbf16>, vector<16x128xf32> -> vector<16x128xf32>
    %c0_58 = arith.constant 0 : index
    %c0_59 = arith.constant 0 : index
    %168 = vector.load %arg12[%c0_58, %c0_59] : memref<1x128xf32, #tpu.memory_space<vmem>>, vector<1x128xf32>
    %169 = vector.broadcast %168 : vector<1x128xf32> to vector<16x128xf32>
    %170 = arith.addf %167, %169 : vector<16x128xf32>
    %cst_60 = arith.constant 1.702000e+00 : f32
    %171 = vector.broadcast %cst_60 : f32 to vector<16x128xf32>
    %172 = arith.mulf %171, %170 : vector<16x128xf32>
    %173 = arith.negf %172 : vector<16x128xf32>
    %174 = math.exp %173 : vector<16x128xf32>
    %cst_61 = arith.constant 1.000000e+00 : f32
    %175 = vector.broadcast %cst_61 : f32 to vector<16x128xf32>
    %176 = arith.addf %175, %174 : vector<16x128xf32>
    %177 = arith.divf %175, %176 : vector<16x128xf32>
    %178 = arith.mulf %170, %177 : vector<16x128xf32>
    %179 = arith.truncf %178 : vector<16x128xf32> to vector<16x128xbf16>
    %c0_62 = arith.constant 0 : index
    %c0_63 = arith.constant 0 : index
    %180 = vector.load %arg13[%c0_62, %c0_63] : memref<128x32xbf16, #tpu.memory_space<vmem>>, vector<128x32xbf16>
    %cst_64 = arith.constant dense<0.000000e+00> : vector<16x32xf32>
    %181 = tpu.matmul %179, %180, %cst_64 {dimension_numbers = #tpu.dot_dimension_numbers<[1], [0], [0], [1], [0, 0, 1, 1], [], []>} : vector<16x128xbf16>, vector<128x32xbf16>, vector<16x32xf32> -> vector<16x32xf32>
    %c0_65 = arith.constant 0 : index
    %c0_66 = arith.constant 0 : index
    %182 = vector.load %arg14[%c0_65, %c0_66] : memref<1x32xf32, #tpu.memory_space<vmem>>, vector<1x32xf32>
    %183 = vector.broadcast %182 : vector<1x32xf32> to vector<16x32xf32>
    %184 = arith.addf %181, %183 : vector<16x32xf32>
    %185 = arith.addf %142, %184 : vector<16x32xf32>
    %186 = vector.shape_cast %185 : vector<16x32xf32> to vector<1x16x32xf32>
    %c0_67 = arith.constant 0 : index
    %c0_68 = arith.constant 0 : index
    %c0_69 = arith.constant 0 : index
    %187 = vector.load %arg15[%c0_67, %c0_68, %c0_69] : memref<1x16x32xf32, #tpu.memory_space<vmem>>, vector<1x16x32xf32>
    tpu.vector_store %arg15[%c0_67, %c0_68, %c0_69], %186 {strides = array<i32>} : memref<1x16x32xf32, #tpu.memory_space<vmem>>, vector<1x16x32xf32>,
    return
  }
  func.func @transform_0(%arg0: i32) -> (i32, i32, i32) {
    %c0_i32 = arith.constant 0 : i32
    %c0_i32_0 = arith.constant 0 : i32
    %c0_i32_1 = arith.constant 0 : i32
    return %arg0, %c0_i32, %c0_i32_0 : i32, i32, i32
  }
  func.func @transform_1(%arg0: i32) -> (i32, i32, i32) {
    %c0_i32 = arith.constant 0 : i32
    %c0_i32_0 = arith.constant 0 : i32
    %c0_i32_1 = arith.constant 0 : i32
    return %arg0, %c0_i32, %c0_i32_0 : i32, i32, i32
  }
  func.func @transform_2(%arg0: i32) -> (i32, i32) {
    %c0_i32 = arith.constant 0 : i32
    %c0_i32_0 = arith.constant 0 : i32
    %c0_i32_1 = arith.constant 0 : i32
    return %c0_i32, %c0_i32_0 : i32, i32
  }
  func.func @transform_3(%arg0: i32) -> (i32, i32) {
    %c0_i32 = arith.constant 0 : i32
    %c0_i32_0 = arith.constant 0 : i32
    %c0_i32_1 = arith.constant 0 : i32
    return %c0_i32, %c0_i32_0 : i32, i32
  }
  func.func @transform_4(%arg0: i32) -> (i32, i32) {
    %c0_i32 = arith.constant 0 : i32
    %c0_i32_0 = arith.constant 0 : i32
    %c0_i32_1 = arith.constant 0 : i32
    return %c0_i32, %c0_i32_0 : i32, i32
  }
  func.func @transform_5(%arg0: i32) -> (i32, i32) {
    %c0_i32 = arith.constant 0 : i32
    %c0_i32_0 = arith.constant 0 : i32
    %c0_i32_1 = arith.constant 0 : i32
    return %c0_i32, %c0_i32_0 : i32, i32
  }
  func.func @transform_6(%arg0: i32) -> (i32, i32) {
    %c0_i32 = arith.constant 0 : i32
    %c0_i32_0 = arith.constant 0 : i32
    %c0_i32_1 = arith.constant 0 : i32
    return %c0_i32, %c0_i32_0 : i32, i32
  }
  func.func @transform_7(%arg0: i32) -> (i32, i32) {
    %c0_i32 = arith.constant 0 : i32
    %c0_i32_0 = arith.constant 0 : i32
    %c0_i32_1 = arith.constant 0 : i32
    return %c0_i32, %c0_i32_0 : i32, i32
  }
  func.func @transform_8(%arg0: i32) -> (i32, i32) {
    %c0_i32 = arith.constant 0 : i32
    %c0_i32_0 = arith.constant 0 : i32
    %c0_i32_1 = arith.constant 0 : i32
    return %c0_i32, %c0_i32_0 : i32, i32
  }
  func.func @transform_9(%arg0: i32) -> (i32, i32) {
    %c0_i32 = arith.constant 0 : i32
    %c0_i32_0 = arith.constant 0 : i32
    %c0_i32_1 = arith.constant 0 : i32
    return %c0_i32, %c0_i32_0 : i32, i32
  }
  func.func @transform_10(%arg0: i32) -> (i32, i32) {
    %c0_i32 = arith.constant 0 : i32
    %c0_i32_0 = arith.constant 0 : i32
    %c0_i32_1 = arith.constant 0 : i32
    return %c0_i32, %c0_i32_0 : i32, i32
  }
  func.func @transform_11(%arg0: i32) -> (i32, i32) {
    %c0_i32 = arith.constant 0 : i32
    %c0_i32_0 = arith.constant 0 : i32
    %c0_i32_1 = arith.constant 0 : i32
    return %c0_i32, %c0_i32_0 : i32, i32
  }
  func.func @transform_12(%arg0: i32) -> (i32, i32) {
    %c0_i32 = arith.constant 0 : i32
    %c0_i32_0 = arith.constant 0 : i32
    %c0_i32_1 = arith.constant 0 : i32
    return %c0_i32, %c0_i32_0 : i32, i32
  }
  func.func @transform_13(%arg0: i32) -> (i32, i32) {
    %c0_i32 = arith.constant 0 : i32
    %c0_i32_0 = arith.constant 0 : i32
    %c0_i32_1 = arith.constant 0 : i32
    return %c0_i32, %c0_i32_0 : i32, i32
  }
  func.func @transform_14(%arg0: i32) -> (i32, i32, i32) {
    %c0_i32 = arith.constant 0 : i32
    %c0_i32_0 = arith.constant 0 : i32
    %c0_i32_1 = arith.constant 0 : i32
    return %arg0, %c0_i32, %c0_i32_0 : i32, i32, i32
  }
}

</mosaic_0001>

<bundles_post_ra>
// kernel: transformer_forward.2
= control target key start
LH: loop header
LB: loop body
LE: loop exit
PB: predicated region body
PF: predicated region fallthrough
CT: control target
= control target key end

     0   :  { %s1530_s29 = smov 0   ;;  %s1730_s0 = inlined_call_operand.vmem [shape: f32[2,16,32], index: 0, kind: input, shape index: {}]   ;;  %s1731_s1 = inlined_call_operand.vmem [shape: f32[2,1,16], index: 1, kind: input, shape index: {}]   ;;  %s1732_s2 = inlined_call_operand.vmem [shape: f32[1,32], index: 2, kind: input, shape index: {}]   ;;  %s1733_s3 = inlined_call_operand.vmem [shape: f32[1,32], index: 3, kind: input, shape index: {}]   ;;  %s1734_s4 = inlined_call_operand.vmem [shape: bf16[32,96], index: 4, kind: input, shape index: {}]   ;;  %s1735_s5 = inlined_call_operand.vmem [shape: f32[1,96], index: 5, kind: input, shape index: {}]   ;;  %s1736_s6 = inlined_call_operand.vmem [shape: bf16[32,32], index: 6, kind: input, shape index: {}]   ;;  %s1737_s7 = inlined_call_operand.vmem [shape: f32[1,32], index: 7, kind: input, shape index: {}]   ;;  %s1738_s8 = inlined_call_operand.vmem [shape: f32[1,32], index: 8, kind: input, shape index: {}]   ;;  %s1739_s9 = inlined_call_operand.vmem [shape: f32[1,32], index: 9, kind: input, shape index: {}]   ;;  %s1740_s10 = inlined_call_operand.vmem [shape: bf16[32,128], index: 10, kind: input, shape index: {}]   ;;  %s1741_s11 = inlined_call_operand.vmem [shape: f32[1,128], index: 11, kind: input, shape index: {}]   ;;  %s1742_s12 = inlined_call_operand.vmem [shape: bf16[128,32], index: 12, kind: input, shape index: {}]   ;;  %s1743_s13 = inlined_call_operand.vmem [shape: f32[1,32], index: 13, kind: input, shape index: {}]   ;;  %s1744_s14 = inlined_call_operand.vmem [shape: f32[2,16,32], index: 14, kind: output, shape index: {}]  }
   0x1 LB: > { %s1254_s30 = sadd.s32 4294967295, %s1438_s29   ;;  %p1258_p0 = scmp.ge.s32.totalorder %s1438_s29, 1  ;;  %s1438_s29 = sphi %s1530_s29, %s24_s29  }
   0x2   : > { %p420_p1 = scmp.lt.s32.totalorder %s1438_s29, 3 }
   0x4   : > { %p421_p2 = pnand %p1258_p0, %p420_p1 }
   0x5   : > { %p469_p3 = scmp.lt.s32.totalorder (!%p421_p2), %s1254_s30, 1  ;;  %s1441_s20 = smov (!%p421_p2), 64  }
   0x6   : > { %424 = sbr.rel (%p421_p2) target bundleno = 2369 (0x941), region = 76  ;;  %s1443_s24 = smov (!%p421_p2), 72  }
   0x7   : > { %s1445_s25 = smov (!%p421_p2), 88   ;;  %s1446_s26 = smov (!%p421_p2), 80  }
   0x8   : > { %s1447_s27 = smov (!%p421_p2), 104   ;;  %s1448_s28 = smov (!%p421_p2), 112  }
   0x9   : > { %s1449_s16 = smov (!%p421_p2), 56   ;;  %s1450_s17 = smov (!%p421_p2), 48  }
   0xa   : > { %s1451_s19 = smov (!%p421_p2), 40   ;;  %s1454_s22 = smov (!%p421_p2), 24  }
   0xb   : > { %s1746_s30 = smov (!%p469_p3, %s1254_s30), 1  ;;  %vm487_vm0 = vcmask 261120   ;;  %v1440_v4 = vmov 32.0   ;;  %v1337_v21 = vld [vmem:[%s1734_s4 + $0x8] sm:$0xff]  ;;  %v1336_v23 = vld [vmem:[%s1734_s4] sm:$0xff]  ;;  %vm600_vm8 = vcmask 64512  }
   0xc   : > { %s1334_s15 = sshll.u32 %s1746_s30, 4  ;;  %s476_s18 = scalar_lea.vmem %s1731_s1, %s1746_s30  ;;  %1382 = vrcp.f32 %v1440_v4  ;;  %579 = vmatpush.bf16.msra.mxu0 %v1337_v21  ;;  %v1374_v42 = vld [vmem:[%s1732_s2] ss:$0 sm:$0xff]  ;;  %vm621_vm9 = vcmask 130048   ;;  %vm754_vm10 = vcmask 130112   ;;  %vm838_vm11 = vcmask 195712  }
   0xd   : > { %s473_s21 = scalar_lea.vmem %s1730_s0, %s1334_s15  ;;  %v1375_v47 = vld [vmem:[%s1733_s3] ss:$0 sm:$0xff]  ;;  %vm922_vm12 = vcmask 261312  }
   0xe   : > { %v1550_v0 = vld [vmem:[%s473_s21] sm:$0xff]  ;;  %v1554_v2 = vld [vmem:[%s473_s21 + $0x8] sm:$0xff]  ;;  %s1442_s21 = smov 96  }
   0xf   : > { %v488_v1 = vsel %vm487_vm0, %v1550_v0, 0.0  ;;  %v491_v3 = vsel %vm487_vm0, %v1554_v2, 0.0  ;;  %v1376_v53 = vld [vmem:[%s1735_s5] ss:$0 sm:$0xff] }
  0x10   : > { %489 = vadd.xlane.f32.xlu0 %v488_v1  ;;  %580 = vmatpush.bf16.msra.mxu0 %v1336_v23 }
  0x12   : > { %v1383_v5 = vpop.eup %1382 }
  0x13   : > { %v495_v6 = vmul.f32 32.0, %v1383_v5  ;;  %vm499_vm1 = vweird.f32 %v1383_v5 }
  0x15   : > { %v496_v7 = vsub.f32 1.0, %v495_v6 }
  0x17   : > { %v497_v8 = vmul.f32 %v1383_v5, %v496_v7 }
  0x18   : > { %492 = vadd.xlane.f32.xlu0 %v491_v3  ;;  %v1596_v3 = vld [vmem:[%s476_s18] ss:$0 sm:$0xff]  ;;  %s1444_s18 = smov 120  }
  0x19   : > { %v498_v9 = vadd.f32 %v1383_v5, %v497_v8 }
  0x1b   : > { %v1558_v10 = vsel %vm499_vm1, %v1383_v5, %v498_v9 }
  0x83   : > { %v490_v11 = vpop.xlane.xlu0 %489 }
  0x84   : > { %v501_v12 = vmul.f32 %v1558_v10, %v490_v11 }
  0x86   : > { %v503_v13 = vsub.f32 %v1550_v0, %v501_v12 }
  0x88   : > { %v505_v14 = vmul.f32 %v503_v13, %v503_v13 }
  0x8a   : > { %v507_v15 = vsel %vm487_vm0, %v505_v14, 0.0 }
  0x8b   : > { %508 = vadd.xlane.f32.xlu1 %v507_v15  ;;  %v493_v16 = vpop.xlane.xlu0 %492 }
  0x8c   : > { %v502_v17 = vmul.f32 %v1558_v10, %v493_v16 }
  0x8e   : > { %v504_v18 = vsub.f32 %v1554_v2, %v502_v17 }
  0x90   : > { %v506_v19 = vmul.f32 %v504_v18, %v504_v18 }
  0x92   : > { %v510_v20 = vsel %vm487_vm0, %v506_v19, 0.0 }
  0x93   : > { %511 = vadd.xlane.f32.xlu1 %v510_v20 }
  0xfe   : > { %v509_v22 = vpop.xlane.xlu1 %508 }
  0xff   : > { %v513_v24 = vmul.f32 %v509_v22, %v1558_v10 }
 0x101   : > { %v515_v25 = vadd.f32 1e-05, %v513_v24 }
 0x103   : > { %1384 = vrsqrt.f32 %v515_v25  ;;  %vm523_vm3 = vweird.f32 %v515_v25 }
 0x106   : > { %v512_v26 = vpop.xlane.xlu1 %511 }
 0x107   : > { %v514_v27 = vmul.f32 %v512_v26, %v1558_v10 }
 0x109   : > { %v1385_v28 = vpop.eup %1384  ;;  %v516_v29 = vadd.f32 1e-05, %v514_v27 }
 0x10a   : > { %v518_v30 = vmul.f32 %v1385_v28, %v515_v25  ;;  %vm524_vm2 = vweird.f32 %v1385_v28 }
 0x10b   : > { %1386 = vrsqrt.f32 %v516_v29  ;;  %vm525_vm4 = vmor %vm523_vm3, %vm524_vm2  ;;  %vm533_vm6 = vweird.f32 %v516_v29 }
 0x10c   : > { %v519_v31 = vmul.f32 %v1385_v28, %v518_v30 }
 0x10e   : > { %v520_v32 = vmul.f32 0.5, %v519_v31 }
 0x110   : > { %v521_v33 = vsub.f32 1.5, %v520_v32 }
 0x111   : > { %v1387_v34 = vpop.eup %1386 }
 0x112   : > { %v522_v35 = vmul.f32 %v1385_v28, %v521_v33  ;;  %v528_v36 = vmul.f32 %v1387_v34, %v516_v29  ;;  %vm534_vm5 = vweird.f32 %v1387_v34 }
 0x113   : > { %vm535_vm7 = vmor %vm533_vm6, %vm534_vm5 }
 0x114   : > { %v529_v37 = vmul.f32 %v1387_v34, %v528_v36  ;;  %v526_v38 = vsel %vm525_vm4, %v1385_v28, %v522_v35 }
 0x115   : > { %v537_v41 = vmul.f32 %v526_v38, %v503_v13 }
 0x116   : > { %v530_v39 = vmul.f32 0.5, %v529_v37 }
 0x117   : > { %v542_v46 = vmul.f32 %v1374_v42, %v537_v41 }
 0x118   : > { %v531_v40 = vsub.f32 1.5, %v530_v39 }
 0x119   : > { %v547_v49 = vadd.f32 %v1375_v47, %v542_v46 }
 0x11a   : > { %v532_v43 = vmul.f32 %v1387_v34, %v531_v40 }
 0x11c   : > { %v536_v44 = vsel %vm535_vm7, %v1387_v34, %v532_v43 }
 0x11d   : > { %v538_v45 = vmul.f32 %v536_v44, %v504_v18 }
 0x11f   : > { %v543_v48 = vmul.f32 %v1374_v42, %v538_v45 }
 0x121   : > { %v548_v50 = vadd.f32 %v1375_v47, %v543_v48 }
 0x123   : > { %v549_v51 = vpack.c.bf16 %v548_v50, %v547_v49 }
 0x125   : > { %1271 = vmatmul.msk.bf16.vlgmr.msra.gmra.mxu0 %vm487_vm0, %v549_v51 }
 0x1a2   : > { %v582_v52 = vpop.f32.mrf.mxu0 }
 0x1a3   : > { %v583_v54 = vadd.f32 %v1376_v53, %v582_v52 }
 0x1a5   : > { %v588_v56 = vpack.c.bf16 %v583_v54, %v583_v54 }
 0x1a7   : > { %v595_v59 = vunpack.c.l.b16 %v588_v56 }
 0x1aa   : > { %v584_v55 = vpop.f32.mrf.mxu0 }
 0x1ab   : > { %v585_v57 = vadd.f32 %v1376_v53, %v584_v55 }
 0x1ad   : > { %v589_v58 = vpack.c.bf16 %v585_v57, %v585_v57 }
 0x1af   : > { %v596_v60 = vunpack.c.l.b16 %v589_v58 }
 0x1b1   : > { %v1584_v61 = vpack.c.b16 %v596_v60, %v595_v59 }
 0x1b3   : > { %651 = vrot.lane.b32.xlu1 %v1584_v61, %s1441_s20  ;;  %598 = vrot.lane.b32.xlu2 %v1584_v61, %s1442_s21  ;;  %s1452_s20 = smov 8   ;;  %s1453_s21 = smov 16  }
 0x20d   : > { %v599_v62 = vpop.permute.xlu2 %598 }
 0x20e   : > { %v605_v63 = vsel %vm600_vm8, %v599_v62, 0 }
 0x20f   : > { %614 = vmatpush.bf16.xpose.msra.mxu1 %v605_v63 }
 0x216   : > { %1272 = vmatmul.msk.bf16.vlgmr.msra.gmra.mxu1 %vm600_vm8, %v1584_v61 }
 0x225   : > { %v652_v1 = vpop.permute.xlu1 %651 }
 0x226   : > { %664 = vmatpush.bf16.msra.mxu2 %v652_v1 }
 0x293   : > { %v616_v4 = vpop.f32.mrf.mxu1 }
 0x294   : > { %v617_v5 = vadd.f32 %v1596_v3, %v616_v4 }
 0x296   : > { %v622_v6 = vsel %vm621_vm9, %v617_v5, -inf }
 0x297   : > { %623 = vmax.xlane.f32.xlu2 %v622_v6 }
 0x29b   : > { %v618_v7 = vpop.f32.mrf.mxu1 }
 0x29c   : > { %v619_v8 = vadd.f32 %v1596_v3, %v618_v7 }
 0x29e   : > { %v625_v9 = vsel %vm621_vm9, %v619_v8, -inf }
 0x29f   : > { %626 = vmax.xlane.f32.xlu0 %v625_v9 }
 0x2af   : > { %843 = vrot.lane.b32.xlu2 %v1584_v61, %s1443_s24 }
 0x30a   : > { %v624_v11 = vpop.xlane.xlu2 %623 }
 0x30b   : > { %v628_v12 = vsub.f32 %v617_v5, %v624_v11 }
 0x30d   : > { %v630_v13 = vmul.f32 1.442695, %v628_v12 }
 0x30f   : > { %1388 = vpow2.f32 %v630_v13 }
 0x312   : > { %v627_v14 = vpop.xlane.xlu0 %626  ;;  %v844_v15 = vpop.permute.xlu2 %843 }
 0x313   : > { %v629_v16 = vsub.f32 %v619_v8, %v627_v14  ;;  %v849_v17 = vsel %vm600_vm8, %v844_v15, 0 }
 0x314   : > { %858 = vmatpush.bf16.xpose.msra.mxu3 %v849_v17 }
 0x315   : > { %v1389_v18 = vpop.eup %1388  ;;  %v632_v19 = vmul.f32 1.442695, %v629_v16 }
 0x316   : > { %v634_v20 = vsel %vm621_vm9, %v1389_v18, 0.0 }
 0x317   : > { %1390 = vpow2.f32 %v632_v19  ;;  %635 = vadd.xlane.f32.xlu1 %v634_v20 }
 0x31d   : > { %v1391_v21 = vpop.eup %1390 }
 0x31e   : > { %v637_v22 = vsel %vm621_vm9, %v1391_v21, 0.0 }
 0x31f   : > { %638 = vadd.xlane.f32.xlu0 %v637_v22 }
 0x330   : > { %673 = vrot.lane.b32.xlu1 %v1584_v61, %s1444_s18 }
 0x333   : > { %675 = vrot.lane.b32.xlu0 %v1584_v61, %s1445_s25 }
 0x338   : > { %759 = vrot.lane.b32.xlu1 %v1584_v61, %s1446_s26 }
 0x33b   : > { %841 = vrot.lane.b32.xlu0 %v1584_v61, %s1447_s27 }
 0x343   : > { %757 = vrot.lane.b32.xlu0 %v1584_v61, %s1448_s28 }
 0x38a   : > { %v636_v23 = vpop.xlane.xlu1 %635 }
 0x38b   : > { %1392 = vrcp.f32 %v636_v23 }
 0x391   : > { %v1393_v25 = vpop.eup %1392 }
 0x392   : > { %v639_v24 = vpop.xlane.xlu0 %638  ;;  %v642_v26 = vmul.f32 %v1393_v25, %v1389_v18 }
 0x393   : > { %1394 = vrcp.f32 %v639_v24 }
 0x394   : > { %v644_v29 = vpack.c.bf16 %v642_v26, %v642_v26 }
 0x396   : > { %v648_v31 = vunpack.c.l.b16 %v644_v29 }
 0x399   : > { %v1395_v27 = vpop.eup %1394 }
 0x39a   : > { %v643_v28 = vmul.f32 %v1395_v27, %v1391_v21 }
 0x39c   : > { %v645_v30 = vpack.c.bf16 %v643_v28, %v643_v28 }
 0x39e   : > { %v649_v32 = vunpack.c.l.b16 %v645_v30 }
 0x3a0   : > { %v650_v33 = vpack.c.b16 %v649_v32, %v648_v31 }
 0x3a2   : > { %1273 = vmatmul.msk.bf16.vlgmr.msra.gmra.mxu2 %vm621_vm9, %v650_v33  ;;  %v674_v34 = vpop.permute.xlu1 %673 }
 0x3a5   : > { %v676_v35 = vpop.permute.xlu0 %675 }
 0x3a6   : > { %v681_v36 = vsel %vm600_vm8, %v676_v35, 0 }
 0x3a7   : > { %690 = vmatpush.bf16.xpose.msrb.mxu2 %v681_v36 }
 0x3aa   : > { %v760_v37 = vpop.permute.xlu1 %759 }
 0x3ab   : > { %v765_v38 = vsel %vm600_vm8, %v760_v37, 0 }
 0x3ac   : > { %774 = vmatpush.bf16.xpose.msrb.mxu0 %v765_v38 }
 0x3ad   : > { %v842_v39 = vpop.permute.xlu0 %841 }
 0x3ae   : > { %1278 = vmatmul.msk.bf16.vlgmr.msra.gmra.mxu3 %vm600_vm8, %v842_v39 }
 0x3b2   : > { %1274 = vmatmul.msk.bf16.vlgmr.msrb.gmra.mxu2 %vm600_vm8, %v674_v34 }
 0x3b5   : > { %v758_v40 = vpop.permute.xlu0 %757 }
 0x3b6   : > { %1276 = vmatmul.msk.bf16.vlgmr.msrb.gmra.mxu0 %vm600_vm8, %v758_v40 }
 0x425   : > { %v666_v41 = vpop.f32.mrf.mxu2 }
 0x426   : > { %671 = vst.msk [vmem:[#allocation2] sm:$0xff] %vm600_vm8, %v666_v41 }
 0x42d   : > { %v668_v42 = vpop.f32.mrf.mxu2 }
 0x42e   : > { %672 = vst.msk [vmem:[#allocation2 + $0x8] sm:$0xff] %vm600_vm8, %v668_v42 }
 0x431   : > { %v860_v43 = vpop.f32.mrf.mxu3 }
 0x432   : > { %v861_v44 = vadd.f32 %v1596_v3, %v860_v43 }
 0x433   : > { %v776_v45 = vpop.f32.mrf.mxu0 }
 0x434   : > { %v865_v46 = vsel %vm621_vm9, %v861_v44, -inf  ;;  %v777_v59 = vadd.f32 %v1596_v3, %v776_v45 }
 0x435   : > { %v692_v47 = vpop.f32.mrf.mxu2  ;;  %866 = vmax.xlane.f32.xlu2 %v865_v46 }
 0x436   : > { %v693_v48 = vadd.f32 %v1596_v3, %v692_v47  ;;  %v781_v60 = vsel %vm621_vm9, %v777_v59, -inf }
 0x438   : > { %v697_v49 = vsel %vm621_vm9, %v693_v48, -inf }
 0x439   : > { %698 = vmax.xlane.f32.xlu1 %v697_v49  ;;  %v862_v50 = vpop.f32.mrf.mxu3 }
 0x43a   : > { %v863_v52 = vadd.f32 %v1596_v3, %v862_v50 }
 0x43b   : > { %v778_v51 = vpop.f32.mrf.mxu0 }
 0x43c   : > { %v779_v53 = vadd.f32 %v1596_v3, %v778_v51  ;;  %v868_v58 = vsel %vm621_vm9, %v863_v52, -inf }
 0x43d   : > { %v694_v54 = vpop.f32.mrf.mxu2 }
 0x43e   : > { %v695_v55 = vadd.f32 %v1596_v3, %v694_v54  ;;  %v784_v56 = vsel %vm621_vm9, %v779_v53, -inf }
 0x43f   : > { %785 = vmax.xlane.f32.xlu2 %v784_v56 }
 0x440   : > { %v700_v57 = vsel %vm621_vm9, %v695_v55, -inf }
 0x441   : > { %701 = vmax.xlane.f32.xlu0 %v700_v57  ;;  %869 = vmax.xlane.f32.xlu1 %v868_v58 }
 0x449   : > { %782 = vmax.xlane.f32.xlu0 %v781_v60 }
 0x457   : > { %726 = vrot.lane.b32.xlu2 %v1584_v61, %s1449_s16 }
 0x4a8   : > { %v867_v62 = vpop.xlane.xlu2 %866 }
 0x4a9   : > { %v871_v63 = vsub.f32 %v861_v44, %v867_v62 }
 0x4ab   : > { %v873_v1 = vmul.f32 1.442695, %v871_v63 }
 0x4ac   : > { %v699_v4 = vpop.xlane.xlu1 %698 }
 0x4ad   : > { %1396 = vpow2.f32 %v873_v1  ;;  %v703_v17 = vsub.f32 %v693_v48, %v699_v4 }
 0x4af   : > { %v705_v22 = vmul.f32 1.442695, %v703_v17 }
 0x4b2   : > { %v786_v5 = vpop.xlane.xlu2 %785 }
 0x4b3   : > { %v1632_v6 = vpop.eup %1396  ;;  %v788_v12 = vsub.f32 %v779_v53, %v786_v5 }
 0x4b4   : > { %v702_v7 = vpop.xlane.xlu0 %701  ;;  %v870_v8 = vpop.xlane.xlu1 %869  ;;  %v877_v9 = vsel %vm621_vm9, %v1632_v6, 0.0 }
 0x4b5   : > { %v872_v3 = vsub.f32 %v863_v52, %v870_v8  ;;  %878 = vadd.xlane.f32.xlu1 %v877_v9  ;;  %v791_v14 = vmul.f32 1.442695, %v788_v12  ;;  %v704_v20 = vsub.f32 %v695_v55, %v702_v7 }
 0x4b7   : > { %v875_v11 = vmul.f32 1.442695, %v872_v3  ;;  %v707_v23 = vmul.f32 1.442695, %v704_v20 }
 0x4b9   : > { %1398 = vpow2.f32 %v875_v11 }
 0x4ba   : > { %v727_v13 = vpop.permute.xlu2 %726  ;;  %1400 = vpow2.f32 %v791_v14 }
 0x4bb   : > { %739 = vmatpush.bf16.msra.mxu2 %v727_v13 }
 0x4bc   : > { %v783_v15 = vpop.xlane.xlu0 %782 }
 0x4bd   : > { %v787_v16 = vsub.f32 %v777_v59, %v783_v15  ;;  %v1339_v15 = vld [vmem:[%s1736_s6 + $0x8] sm:$0xff] }
 0x4be   : > { %957 = vmatpush.bf16.msra.mxu0 %v1339_v15 }
 0x4bf   : > { %v789_v18 = vmul.f32 1.442695, %v787_v16  ;;  %v1399_v19 = vpop.eup %1398  ;;  %v1338_v16 = vld [vmem:[%s1736_s6] sm:$0xff] }
 0x4c0   : > { %v880_v21 = vsel %vm621_vm9, %v1399_v19, 0.0  ;;  %v1401_v24 = vpop.eup %1400 }
 0x4c1   : > { %1402 = vpow2.f32 %v789_v18  ;;  %881 = vadd.xlane.f32.xlu0 %v880_v21  ;;  %v796_v27 = vsel %vm621_vm9, %v1401_v24, 0.0 }
 0x4c2   : > { %1404 = vpow2.f32 %v705_v22  ;;  %958 = vmatpush.bf16.msra.mxu0 %v1338_v16  ;;  %v1344_v16 = vld [vmem:[%s1742_s12 + $0x10] sm:$0xff] }
 0x4c3   : > { %1406 = vpow2.f32 %v707_v23  ;;  %v1377_v23 = vld [vmem:[%s1737_s7] ss:$0 sm:$0xff] }
 0x4c7   : > { %v1403_v25 = vpop.eup %1402 }
 0x4c8   : > { %v793_v26 = vsel %vm621_vm9, %v1403_v25, 0.0  ;;  %v1405_v28 = vpop.eup %1404 }
 0x4c9   : > { %794 = vadd.xlane.f32.xlu1 %v793_v26  ;;  %797 = vadd.xlane.f32.xlu0 %v796_v27  ;;  %v1407_v29 = vpop.eup %1406  ;;  %v709_v30 = vsel %vm621_vm9, %v1405_v28, 0.0 }
 0x4ca   : > { %v712_v31 = vsel %vm621_vm9, %v1407_v29, 0.0 }
 0x4d1   : > { %710 = vadd.xlane.f32.xlu1 %v709_v30  ;;  %713 = vadd.xlane.f32.xlu0 %v712_v31 }
 0x4e5   : > { %810 = vrot.lane.b32.xlu0 %v1584_v61, %s1450_s17 }
 0x4ea   : > { %894 = vrot.lane.b32.xlu1 %v1584_v61, %s1451_s19 }
 0x528   : > { %v879_v32 = vpop.xlane.xlu1 %878 }
 0x534   : > { %v882_v33 = vpop.xlane.xlu0 %881 }
 0x53c   : > { %v795_v34 = vpop.xlane.xlu1 %794  ;;  %v798_v35 = vpop.xlane.xlu0 %797 }
 0x53d   : > { %1408 = vrcp.f32 %v795_v34 }
 0x53e   : > { %1410 = vrcp.f32 %v798_v35 }
 0x543   : > { %v1409_v38 = vpop.eup %1408 }
 0x544   : > { %v711_v36 = vpop.xlane.xlu1 %710  ;;  %v714_v37 = vpop.xlane.xlu0 %713  ;;  %v801_v44 = vmul.f32 %v1409_v38, %v1403_v25 }
 0x545   : > { %1412 = vrcp.f32 %v711_v36  ;;  %v1411_v39 = vpop.eup %1410 }
 0x546   : > { %1414 = vrcp.f32 %v714_v37  ;;  %v802_v45 = vmul.f32 %v1411_v39, %v1401_v24  ;;  %v803_v49 = vpack.c.bf16 %v801_v44, %v801_v44 }
 0x547   : > { %1416 = vrcp.f32 %v882_v33 }
 0x548   : > { %1418 = vrcp.f32 %v879_v32  ;;  %v804_v50 = vpack.c.bf16 %v802_v45, %v802_v45  ;;  %v807_v54 = vunpack.c.l.b16 %v803_v49 }
 0x54a   : > { %v808_v55 = vunpack.c.l.b16 %v804_v50 }
 0x54b   : > { %v1413_v40 = vpop.eup %1412 }
 0x54c   : > { %v1415_v41 = vpop.eup %1414  ;;  %v717_v42 = vmul.f32 %v1413_v40, %v1405_v28  ;;  %v809_v59 = vpack.c.b16 %v808_v55, %v807_v54  ;;  %v1341_v40 = vld [vmem:[%s1740_s10 + $0x8] sm:$0xff] }
 0x54d   : > { %v718_v43 = vmul.f32 %v1415_v41, %v1407_v29  ;;  %v1417_v52 = vpop.eup %1416 }
 0x54e   : > { %v719_v61 = vpack.c.bf16 %v717_v42, %v717_v42  ;;  %v1419_v53 = vpop.eup %1418  ;;  %v886_v56 = vmul.f32 %v1417_v52, %v1399_v19 }
 0x54f   : > { %v720_v46 = vpack.c.bf16 %v718_v43, %v718_v43  ;;  %v885_v58 = vmul.f32 %v1419_v53, %v1632_v6  ;;  %v1340_v43 = vld [vmem:[%s1740_s10] sm:$0xff] }
 0x550   : > { %v723_v47 = vunpack.c.l.b16 %v719_v61  ;;  %v888_v60 = vpack.c.bf16 %v886_v56, %v886_v56 }
 0x551   : > { %v724_v48 = vunpack.c.l.b16 %v720_v46  ;;  %v887_v63 = vpack.c.bf16 %v885_v58, %v885_v58 }
 0x552   : > { %v892_v1 = vunpack.c.l.b16 %v888_v60 }
 0x553   : > { %v725_v51 = vpack.c.b16 %v724_v48, %v723_v47  ;;  %v891_v4 = vunpack.c.l.b16 %v887_v63  ;;  %v1379_v63 = vld [vmem:[%s1739_s9] ss:$0 sm:$0xff] }
 0x555   : > { %1275 = vmatmul.msk.bf16.vlgmr.msra.gmra.mxu2 %vm621_vm9, %v725_v51  ;;  %v893_v5 = vpack.c.b16 %v892_v1, %v891_v4 }
 0x557   : > { %v811_v57 = vpop.permute.xlu0 %810 }
 0x558   : > { %823 = vmatpush.bf16.msrb.mxu1 %v811_v57 }
 0x55b   : > { %1277 = vmatmul.msk.bf16.vlgmr.msrb.gmra.mxu1 %vm621_vm9, %v809_v59 }
 0x55c   : > { %v895_v62 = vpop.permute.xlu1 %894  ;;  %1053 = vmatpush.bf16.msra.mxu1 %v1341_v40 }
 0x55d   : > { %907 = vmatpush.bf16.msrb.mxu2 %v895_v62 }
 0x560   : > { %1054 = vmatpush.bf16.msra.mxu1 %v1340_v43 }
 0x565   : > { %1279 = vmatmul.msk.bf16.vlgmr.msrb.gmra.mxu2 %vm621_vm9, %v893_v5 }
 0x5d8   : > { %v741_v7 = vpop.f32.mrf.mxu2  ;;  %v825_v8 = vpop.f32.mrf.mxu1 }
 0x5d9   : > { %748 = vrot.lane.b32.xlu2 %v741_v7, %s1452_s20  ;;  %832 = vrot.lane.b32.xlu0 %v825_v8, %s1453_s21 }
 0x5e0   : > { %v743_v6 = vpop.f32.mrf.mxu2  ;;  %v827_v9 = vpop.f32.mrf.mxu1 }
 0x5e1   : > { %750 = vrot.lane.b32.xlu2 %v743_v6, %s1452_s20  ;;  %s481_s20 = scalar_lea.vmem %s1744_s14, %s1334_s15 }
 0x5e8   : > { %v909_v3 = vpop.f32.mrf.mxu2 }
 0x5e9   : > { %834 = vrot.lane.b32.xlu2 %v827_v9, %s1453_s21  ;;  %916 = vrot.lane.b32.xlu1 %v909_v3, %s1454_s22  ;;  %v1349_v9 = vld [vmem:[%s1742_s12 + $0x38] sm:$0xff]  ;;  %v1348_v3 = vld [vmem:[%s1742_s12 + $0x30] sm:$0xff] }
 0x5ea   : > { %1172 = vmatpush.bf16.msrb.mxu3 %v1349_v9 }
 0x5ee   : > { %1173 = vmatpush.bf16.msrb.mxu3 %v1348_v3 }
 0x5f0   : > { %v911_v11 = vpop.f32.mrf.mxu2 }
 0x5f1   : > { %918 = vrot.lane.b32.xlu0 %v911_v11, %s1454_s22  ;;  %v1347_v11 = vld [vmem:[%s1742_s12 + $0x28] sm:$0xff] }
 0x5f2   : > { %1174 = vmatpush.bf16.msrb.mxu3 %v1347_v11 }
 0x633   : > { %v749_v12 = vpop.permute.xlu2 %748 }
 0x634   : > { %755 = vst.msk [vmem:[#allocation2] sm:$0xff] %vm754_vm10, %v749_v12  ;;  %v1346_v12 = vld [vmem:[%s1742_s12 + $0x20] sm:$0xff] }
 0x635   : > { %1175 = vmatpush.bf16.msrb.mxu3 %v1346_v12 }
 0x63b   : > { %v751_v13 = vpop.permute.xlu2 %750 }
 0x63c   : > { %756 = vst.msk [vmem:[#allocation2 + $0x8] sm:$0xff] %vm754_vm10, %v751_v13  ;;  %v1345_v13 = vld [vmem:[%s1742_s12 + $0x18] sm:$0xff] }
 0x63d   : > { %1176 = vmatpush.bf16.msrb.mxu3 %v1345_v13 }
 0x641   : > { %1177 = vmatpush.bf16.msrb.mxu3 %v1344_v16 }
 0x643   : > { %v835_v14 = vpop.permute.xlu2 %834 }
 0x644   : > { %840 = vst.msk [vmem:[#allocation2 + $0x8] sm:$0xff] %vm838_vm11, %v835_v14  ;;  %v1380_v14 = vld [vmem:[%s1741_s11] ss:$0 sm:$0xff] }
 0x64b   : > { %v833_v17 = vpop.permute.xlu0 %832 }
 0x64c   : > { %839 = vst.msk [vmem:[#allocation2] sm:$0xff] %vm838_vm11, %v833_v17 }
 0x65b   : > { %v917_v18 = vpop.permute.xlu1 %916 }
 0x65c   : > { %923 = vst.msk [vmem:[#allocation2] sm:$0xff] %vm922_vm12, %v917_v18 }
 0x663   : > { %v919_v19 = vpop.permute.xlu0 %918  ;;  %v925_v20 = vld [vmem:[#allocation2] sm:$0xff] }
 0x664   : > { %924 = vst.msk [vmem:[#allocation2 + $0x8] sm:$0xff] %vm922_vm12, %v919_v19  ;;  %v1343_v19 = vld [vmem:[%s1742_s12 + $0x8] sm:$0xff] }
 0x665   : > { %1178 = vmatpush.bf16.msrb.mxu3 %v1343_v19 }
 0x66b   : > { %v926_v21 = vld [vmem:[#allocation2 + $0x8] sm:$0xff] }
 0x66c   : > { %v927_v22 = vpack.c.bf16 %v926_v21, %v925_v20 }
 0x66e   : > { %1288 = vmatmul.msk.bf16.vlgmr.msra.gmra.mxu0 %vm487_vm0, %v927_v22  ;;  %v1342_v22 = vld [vmem:[%s1742_s12] sm:$0xff] }
 0x66f   : > { %1179 = vmatpush.bf16.msrb.mxu3 %v1342_v22 }
 0x6eb   : > { %v960_v24 = vpop.f32.mrf.mxu0 }
 0x6ec   : > { %v961_v25 = vadd.f32 %v1377_v23, %v960_v24 }
 0x6ee   : > { %v1658_v26 = vadd.f32 %v961_v25, %v1550_v0 }
 0x6f0   : > { %v969_v27 = vsel %vm487_vm0, %v1658_v26, 0.0 }
 0x6f1   : > { %970 = vadd.xlane.f32.xlu2 %v969_v27 }
 0x6f3   : > { %v962_v28 = vpop.f32.mrf.mxu0 }
 0x6f4   : > { %v963_v29 = vadd.f32 %v1377_v23, %v962_v28 }
 0x6f6   : > { %v1663_v30 = vadd.f32 %v963_v29, %v1554_v2 }
 0x6f8   : > { %v972_v31 = vsel %vm487_vm0, %v1663_v30, 0.0 }
 0x6f9   : > { %973 = vadd.xlane.f32.xlu1 %v972_v31 }
 0x764   : > { %v971_v32 = vpop.xlane.xlu2 %970 }
 0x765   : > { %v975_v33 = vmul.f32 %v971_v32, %v1558_v10 }
 0x767   : > { %v977_v34 = vsub.f32 %v1658_v26, %v975_v33 }
 0x769   : > { %v979_v0 = vmul.f32 %v977_v34, %v977_v34 }
 0x76b   : > { %v981_v35 = vsel %vm487_vm0, %v979_v0, 0.0 }
 0x76c   : > { %v974_v36 = vpop.xlane.xlu1 %973  ;;  %982 = vadd.xlane.f32.xlu0 %v981_v35 }
 0x76d   : > { %v976_v37 = vmul.f32 %v974_v36, %v1558_v10 }
 0x76f   : > { %v978_v38 = vsub.f32 %v1663_v30, %v976_v37 }
 0x771   : > { %v980_v2 = vmul.f32 %v978_v38, %v978_v38 }
 0x773   : > { %v984_v39 = vsel %vm487_vm0, %v980_v2, 0.0 }
 0x774   : > { %985 = vadd.xlane.f32.xlu2 %v984_v39 }
 0x7df   : > { %v983_v41 = vpop.xlane.xlu0 %982 }
 0x7e0   : > { %v987_v42 = vmul.f32 %v983_v41, %v1558_v10 }
 0x7e2   : > { %v989_v44 = vadd.f32 1e-05, %v987_v42 }
 0x7e4   : > { %1420 = vrsqrt.f32 %v989_v44  ;;  %vm997_vm14 = vweird.f32 %v989_v44 }
 0x7e7   : > { %v986_v45 = vpop.xlane.xlu2 %985 }
 0x7e8   : > { %v988_v61 = vmul.f32 %v986_v45, %v1558_v10  ;;  %v1378_v10 = vld [vmem:[%s1738_s8] ss:$0 sm:$0xff] }
 0x7ea   : > { %v1421_v46 = vpop.eup %1420  ;;  %v990_v47 = vadd.f32 1e-05, %v988_v61 }
 0x7eb   : > { %v992_v48 = vmul.f32 %v1421_v46, %v989_v44  ;;  %vm998_vm13 = vweird.f32 %v1421_v46 }
 0x7ec   : > { %1422 = vrsqrt.f32 %v990_v47  ;;  %vm999_vm15 = vmor %vm997_vm14, %vm998_vm13  ;;  %vm1007_vm2 = vweird.f32 %v990_v47 }
 0x7ed   : > { %v993_v49 = vmul.f32 %v1421_v46, %v992_v48 }
 0x7ef   : > { %v994_v50 = vmul.f32 0.5, %v993_v49 }
 0x7f1   : > { %v995_v51 = vsub.f32 1.5, %v994_v50 }
 0x7f2   : > { %v1423_v52 = vpop.eup %1422 }
 0x7f3   : > { %v996_v53 = vmul.f32 %v1421_v46, %v995_v51  ;;  %v1002_v54 = vmul.f32 %v1423_v52, %v990_v47  ;;  %vm1008_vm1 = vweird.f32 %v1423_v52 }
 0x7f4   : > { %vm1009_vm3 = vmor %vm1007_vm2, %vm1008_vm1 }
 0x7f5   : > { %v1003_v55 = vmul.f32 %v1423_v52, %v1002_v54  ;;  %v1000_v56 = vsel %vm999_vm15, %v1421_v46, %v996_v53 }
 0x7f6   : > { %v1011_v59 = vmul.f32 %v1000_v56, %v977_v34 }
 0x7f7   : > { %v1004_v57 = vmul.f32 0.5, %v1003_v55 }
 0x7f8   : > { %v1016_v1 = vmul.f32 %v1378_v10, %v1011_v59 }
 0x7f9   : > { %v1005_v58 = vsub.f32 1.5, %v1004_v57 }
 0x7fa   : > { %v1021_v7 = vadd.f32 %v1379_v63, %v1016_v1 }
 0x7fb   : > { %v1006_v60 = vmul.f32 %v1423_v52, %v1005_v58 }
 0x7fd   : > { %v1010_v62 = vsel %vm1009_vm3, %v1423_v52, %v1006_v60  ;;  %v1381_v52 = vld [vmem:[%s1743_s13] ss:$0 sm:$0xff] }
 0x7fe   : > { %v1012_v4 = vmul.f32 %v1010_v62, %v978_v38 }
 0x800   : > { %v1017_v5 = vmul.f32 %v1378_v10, %v1012_v4 }
 0x802   : > { %v1022_v8 = vadd.f32 %v1379_v63, %v1017_v5 }
 0x804   : > { %v1023_v6 = vpack.c.bf16 %v1022_v8, %v1021_v7 }
 0x806   : > { %1297 = vmatmul.msk.bf16.vlgmr.msra.gmra.mxu1 %vm487_vm0, %v1023_v6 }
 0x883   : > { %v1056_v15 = vpop.f32.mrf.mxu1 }
 0x884   : > { %v1057_v17 = vadd.f32 %v1380_v14, %v1056_v15 }
 0x886   : > { %v1298_v18 = vmul.f32 -1.702, %v1057_v17 }
 0x888   : > { %v1065_v20 = vmul.f32 1.442695, %v1298_v18 }
 0x88a   : > { %1424 = vpow2.f32 %v1065_v20 }
 0x88b   : > { %v1058_v21 = vpop.f32.mrf.mxu1 }
 0x88c   : > { %v1059_v23 = vadd.f32 %v1380_v14, %v1058_v21 }
 0x88e   : > { %v1299_v24 = vmul.f32 -1.702, %v1059_v23 }
 0x890   : > { %v1425_v25 = vpop.eup %1424  ;;  %v1067_v27 = vmul.f32 1.442695, %v1299_v24 }
 0x891   : > { %v1069_v28 = vadd.f32 1.0, %v1425_v25 }
 0x892   : > { %1426 = vpow2.f32 %v1067_v27 }
 0x893   : > { %1428 = vrcp.f32 %v1069_v28  ;;  %v1082_v38 = vand.u32 2147483648, %v1069_v28  ;;  %vm1076_vm5 = vweird.f32 %v1069_v28  ;;  %v1080_v2 = vand.u32 2147483647, %v1069_v28 }
 0x895   : > { %v1083_v44 = vor.u32 1.1754944e-38, %v1082_v38  ;;  %vm1081_vm8 = vcmp.eq.f32.partialorder %v1080_v2, 8.507059e+37 }
 0x898   : > { %v1427_v29 = vpop.eup %1426 }
 0x899   : > { %v1429_v31 = vpop.eup %1428  ;;  %v1070_v32 = vadd.f32 1.0, %v1427_v29 }
 0x89a   : > { %v1072_v33 = vmul.f32 %v1429_v31, %v1069_v28  ;;  %vm1077_vm4 = vweird.f32 %v1429_v31 }
 0x89b   : > { %1430 = vrcp.f32 %v1070_v32  ;;  %vm1078_vm6 = vmor %vm1076_vm5, %vm1077_vm4  ;;  %v1097_v40 = vand.u32 2147483648, %v1070_v32  ;;  %v1095_v43 = vand.u32 2147483647, %v1070_v32  ;;  %vm1091_vm9 = vweird.f32 %v1070_v32 }
 0x89c   : > { %v1073_v34 = vsub.f32 1.0, %v1072_v33 }
 0x89d   : > { %v1098_v46 = vor.u32 1.1754944e-38, %v1097_v40  ;;  %vm1096_vm11 = vcmp.eq.f32.partialorder %v1095_v43, 8.507059e+37 }
 0x89e   : > { %v1074_v0 = vmul.f32 %v1429_v31, %v1073_v34 }
 0x8a0   : > { %v1075_v36 = vadd.f32 %v1429_v31, %v1074_v0 }
 0x8a1   : > { %v1431_v35 = vpop.eup %1430 }
 0x8a2   : > { %v1087_v37 = vmul.f32 %v1431_v35, %v1070_v32  ;;  %v1079_v41 = vsel %vm1078_vm6, %v1429_v31, %v1075_v36  ;;  %vm1092_vm7 = vweird.f32 %v1431_v35 }
 0x8a3   : > { %v1084_v61 = vsel %vm1081_vm8, %v1083_v44, %v1079_v41  ;;  %vm1093_vm10 = vmor %vm1091_vm9, %vm1092_vm7 }
 0x8a4   : > { %v1088_v39 = vsub.f32 1.0, %v1087_v37  ;;  %v1101_v49 = vmul.f32 %v1084_v61, %v1057_v17 }
 0x8a6   : > { %v1089_v42 = vmul.f32 %v1431_v35, %v1088_v39 }
 0x8a8   : > { %v1090_v45 = vadd.f32 %v1431_v35, %v1089_v42 }
 0x8aa   : > { %v1094_v47 = vsel %vm1093_vm10, %v1431_v35, %v1090_v45 }
 0x8ab   : > { %v1099_v48 = vsel %vm1096_vm11, %v1098_v46, %v1094_v47 }
 0x8ac   : > { %v1102_v50 = vmul.f32 %v1099_v48, %v1059_v23 }
 0x8ae   : > { %v1103_v51 = vpack.c.bf16 %v1102_v50, %v1101_v49 }
 0x8b0   : > { %1180 = vmatmul.bf16.vlgmr.msrb.gmra.mxu3 %v1103_v51 }
 0x933   : > { %v1181_v53 = vpop.f32.mrf.mxu3 }
 0x934   : > { %v1182_v54 = vadd.f32 %v1381_v52, %v1181_v53 }
 0x936   : > { %v1186_v55 = vadd.f32 %v1182_v54, %v1658_v26 }
 0x938   : > { %1188 = vst.msk [vmem:[%s481_s20] sm:$0xff] %vm487_vm0, %v1186_v55 }
 0x93b   : > { %v1183_v56 = vpop.f32.mrf.mxu3 }
 0x93c   : > { %v1184_v57 = vadd.f32 %v1381_v52, %v1183_v56 }
 0x93e   : > { %v1187_v58 = vadd.f32 %v1184_v57, %v1663_v30 }
 0x940   : > { %1189 = vst.msk [vmem:[%s481_s20 + $0x8] sm:$0xff] %vm487_vm0, %v1187_v58 }
 0x941 PF: > { %s24_s29 = sadd.s32 1, %s1438_s29  }
 0x942   : > { %p21_p4 = scmp.ge.s32.totalorder %s24_s29, 4  }
 0x944   :  { %23 = sbr.rel (!%p21_p4) target bundleno = 1 (0x1), region = 109 }

</bundles_post_ra>
